<compile_context>
chip_gen: v7x
topology: tpu7x:2x2x1
jax: 0.10.0
libtpu: 0.0.40
codegen_flags: <defaults>
</compile_context>

<pallas_src>
import functools
import math

import jax
import jax.numpy as jnp
from jax import lax
from jax.experimental import pallas as pl
from jax.experimental.pallas import tpu as pltpu


def _add_norm_kernel(x_ref, s_ref, o_ref, *, eps):
    """Fused residual-add + LayerNorm over all non-batch dims.

    Block view is (block_b, R, C); normalization statistics are computed per
    batch row (reduce over axes 1 and 2).  Only one full-size f32 temporary
    (`y`) stays live across the writeback.
    """
    y = x_ref[...].astype(jnp.float32) + s_ref[...].astype(jnp.float32)
    # TODO(synk): nn.Dropout(config.p) omitted — identity at inference time.
    mean = jnp.mean(y, axis=(1, 2), keepdims=True)
    # Biased variance, same as torch LayerNorm; two-pass form (no one-pass
    # E[y^2]-mean^2) for numerical robustness, but the centered value is not
    # kept as a second full-size temp.
    var = jnp.mean(jnp.square(y - mean), axis=(1, 2), keepdims=True)
    o_ref[...] = ((y - mean) * lax.rsqrt(var + eps)).astype(o_ref.dtype)


def add_norm1(x, sub_output, *, eps=1e-5, block_b=None):
    """Fused (x + sub_output) -> LayerNorm over all non-batch dims.

    x, sub_output: same-shape arrays, leading dim = batch.
    Fresh nn.LayerNorm each forward => affine params are identity.
    """
    assert x.shape == sub_output.shape, (x.shape, sub_output.shape)
    orig_shape = x.shape
    B = orig_shape[0]
    F = math.prod(orig_shape[1:])

    # Lane-dense trailing view: (B, R, C) with C a multiple of 128 when
    # possible so output stores are unmasked vst (block last-two dims equal
    # the full array dims, so the (8,128) BlockSpec constraint never triggers).
    if F % 128 == 0:
        C = 128
        R = F // 128
    else:
        # TODO(synk): F not a multiple of 128 -> masked partial stores (correct, slower).
        C, R = F, 1

    x3 = x.reshape(B, R, C)
    s3 = sub_output.reshape(B, R, C)

    itemsize = jnp.dtype(x.dtype).itemsize
    # Per-batch-row VMEM footprint of one grid block:
    #   (2 inputs + 1 output) x double-buffered   +   ~2 full-size f32 body temps.
    per_row_bytes = 3 * 2 * F * itemsize + 2 * F * 4

    # Stay well under the tightest default scoped-VMEM limit (16 MiB on v5e).
    budget = 12 << 20

    if block_b is None:
        vmem_cap_b = max(1, budget // per_row_bytes)
        # Keep >= ~8 grid steps when the batch allows it: the "parallel" axis
        # can then shard across TensorCores (v7x) and the DMA pipeline has
        # something to overlap with.  Never collapse to a single step if B > 1.
        block_b = max(1, min(vmem_cap_b, pl.cdiv(B, 8)))
    block_b = max(1, min(block_b, B))

    footprint = block_b * per_row_bytes
    compiler_kwargs = {"dimension_semantics": ("parallel",)}
    if footprint > budget:
        # Even one batch row overflows the conservative default budget:
        # raise the scoped-VMEM limit explicitly (<= 48 MiB keeps headroom on
        # every generation, including v7x's 64 MiB physical VMEM).
        if footprint + (4 << 20) <= (48 << 20):
            compiler_kwargs["vmem_limit_bytes"] = int(footprint + (4 << 20))
        else:
            # TODO(synk): very long rows need an S-tiled two-pass inner
            # pipeline (stats pass then normalize pass via pltpu.emit_pipeline).
            raise NotImplementedError(
                f"one batch row needs ~{footprint >> 20} MiB of VMEM; "
                "S-tiled fallback not implemented")

    grid = (pl.cdiv(B, block_b),)
    kernel = functools.partial(_add_norm_kernel, eps=eps)

    out = pl.pallas_call(
        kernel,
        out_shape=jax.ShapeDtypeStruct((B, R, C), x.dtype),
        grid=grid,
        in_specs=[
            pl.BlockSpec((block_b, R, C), lambda b: (b, 0, 0)),
            pl.BlockSpec((block_b, R, C), lambda b: (b, 0, 0)),
        ],
        out_specs=pl.BlockSpec((block_b, R, C), lambda b: (b, 0, 0)),
        compiler_params=pltpu.CompilerParams(**compiler_kwargs),
    )(x3, s3)

    return out.reshape(orig_shape)


if __name__ == "__main__":
    key = jax.random.PRNGKey(0)
    kx, kw = jax.random.split(key)

    # Small transformer-block-like shapes: (batch, seq, d_model).
    B, S, D = 2, 8, 128

    x = jax.random.normal(kx, (B, S, D), dtype=jnp.float32)

    # sub_layer is an arbitrary user callable in the PyTorch module; here a
    # simple deterministic JAX stand-in produces its output, which is what the
    # fused kernel consumes.
    w = jax.random.normal(kw, (D, D), dtype=jnp.float32) * 0.05
    sub_output = jnp.tanh(x @ w)

    y = add_norm1(x, sub_output)
    jax.block_until_ready(y)

    # Pure-JAX reference (residual add + LayerNorm over all non-batch dims).
    r = x + sub_output
    mean = r.mean(axis=(1, 2), keepdims=True)
    var = ((r - mean) ** 2).mean(axis=(1, 2), keepdims=True)
    ref = (r - mean) / jnp.sqrt(var + 1e-5)

    assert y.shape == (B, S, D), y.shape
    assert jnp.allclose(y, ref, atol=1e-5, rtol=1e-5), float(jnp.max(jnp.abs(y - ref)))
    print("KERNEL_OK")
</pallas_src>

<mosaic_0001>
module attributes {stable_mosaic.version = 11 : i64} {
  func.func @_add_norm_kernel(%arg0: i32, %arg1: memref<1x8x128xf32, #tpu.memory_space<vmem>>, %arg2: memref<1x8x128xf32, #tpu.memory_space<vmem>>, %arg3: memref<1x8x128xf32, #tpu.memory_space<vmem>>) attributes {dimension_semantics = [#tpu.dimension_semantics<parallel>], iteration_bounds = array<i64: 2>, scalar_prefetch = 0 : i64, scratch_operands = 0 : i64, tpu.core_type = #tpu.core_type<tc>, window_params = [{transform_indices = @transform_0, window_bounds = array<i64: 1, 8, 128>}, {transform_indices = @transform_1, window_bounds = array<i64: 1, 8, 128>}, {transform_indices = @transform_2, window_bounds = array<i64: 1, 8, 128>}]} {
    %c0 = arith.constant 0 : index
    %c0_0 = arith.constant 0 : index
    %c0_1 = arith.constant 0 : index
    %0 = vector.load %arg1[%c0, %c0_0, %c0_1] : memref<1x8x128xf32, #tpu.memory_space<vmem>>, vector<1x8x128xf32>
    %c0_2 = arith.constant 0 : index
    %c0_3 = arith.constant 0 : index
    %c0_4 = arith.constant 0 : index
    %1 = vector.load %arg2[%c0_2, %c0_3, %c0_4] : memref<1x8x128xf32, #tpu.memory_space<vmem>>, vector<1x8x128xf32>
    %2 = arith.addf %0, %1 : vector<1x8x128xf32>
    %cst = arith.constant dense<0.000000e+00> : vector<1xf32>
    %3 = vector.multi_reduction <add>, %2, %cst [1, 2] : vector<1x8x128xf32> to vector<1xf32>
    %4 = vector.shape_cast %3 : vector<1xf32> to vector<1x1x1xf32>
    %cst_5 = arith.constant 1.024000e+03 : f32
    %5 = vector.broadcast %cst_5 : f32 to vector<1x1x1xf32>
    %6 = arith.divf %4, %5 : vector<1x1x1xf32>
    %7 = vector.broadcast %6 : vector<1x1x1xf32> to vector<1x8x128xf32>
    %8 = arith.subf %2, %7 : vector<1x8x128xf32>
    %9 = arith.mulf %8, %8 : vector<1x8x128xf32>
    %cst_6 = arith.constant dense<0.000000e+00> : vector<1xf32>
    %10 = vector.multi_reduction <add>, %9, %cst_6 [1, 2] : vector<1x8x128xf32> to vector<1xf32>
    %11 = vector.shape_cast %10 : vector<1xf32> to vector<1x1x1xf32>
    %cst_7 = arith.constant 1.024000e+03 : f32
    %12 = vector.broadcast %cst_7 : f32 to vector<1x1x1xf32>
    %13 = arith.divf %11, %12 : vector<1x1x1xf32>
    %14 = vector.broadcast %6 : vector<1x1x1xf32> to vector<1x8x128xf32>
    %15 = arith.subf %2, %14 : vector<1x8x128xf32>
    %cst_8 = arith.constant 9.99999974E-6 : f32
    %16 = vector.broadcast %cst_8 : f32 to vector<1x1x1xf32>
    %17 = arith.addf %13, %16 : vector<1x1x1xf32>
    %18 = math.rsqrt %17 : vector<1x1x1xf32>
    %19 = vector.broadcast %18 : vector<1x1x1xf32> to vector<1x8x128xf32>
    %20 = arith.mulf %15, %19 : vector<1x8x128xf32>
    %c0_9 = arith.constant 0 : index
    %c0_10 = arith.constant 0 : index
    %c0_11 = arith.constant 0 : index
    %21 = vector.load %arg3[%c0_9, %c0_10, %c0_11] : memref<1x8x128xf32, #tpu.memory_space<vmem>>, vector<1x8x128xf32>
    tpu.vector_store %arg3[%c0_9, %c0_10, %c0_11], %20 {strides = array<i32>} : memref<1x8x128xf32, #tpu.memory_space<vmem>>, vector<1x8x128xf32>,
    return
  }
  func.func @transform_0(%arg0: i32) -> (i32, i32, i32) {
    %c0_i32 = arith.constant 0 : i32
    %c0_i32_0 = arith.constant 0 : i32
    %c0_i32_1 = arith.constant 0 : i32
    return %arg0, %c0_i32, %c0_i32_0 : i32, i32, i32
  }
  func.func @transform_1(%arg0: i32) -> (i32, i32, i32) {
    %c0_i32 = arith.constant 0 : i32
    %c0_i32_0 = arith.constant 0 : i32
    %c0_i32_1 = arith.constant 0 : i32
    return %arg0, %c0_i32, %c0_i32_0 : i32, i32, i32
  }
  func.func @transform_2(%arg0: i32) -> (i32, i32, i32) {
    %c0_i32 = arith.constant 0 : i32
    %c0_i32_0 = arith.constant 0 : i32
    %c0_i32_1 = arith.constant 0 : i32
    return %arg0, %c0_i32, %c0_i32_0 : i32, i32, i32
  }
}

</mosaic_0001>

<bundles_post_ra>
// kernel: tpu_custom_call.1
= control target key start
LH: loop header
LB: loop body
LE: loop exit
PB: predicated region body
PF: predicated region fallthrough
CT: control target
= control target key end

     0   :  { %7 = vsyncpa [#allocation3], 0  ;;  %s763_s0 = inlined_call_operand.hbm [shape: f32[2,8,128], index: 0, kind: input, shape index: {}]   ;;  %s764_s1 = inlined_call_operand.hbm [shape: f32[2,8,128], index: 1, kind: input, shape index: {}]   ;;  %s765_s2 = inlined_call_operand.hbm [shape: f32[2,8,128], index: 2, kind: output, shape index: {}]  }
   0x1   :  { %9 = vsyncpa [#allocation3 + $0x1], 0 }
   0x2   :  { %10 = vsyncpa [#allocation6], 0 }
   0x3   :  { %12 = vsyncpa [#allocation6 + $0x1], 0 }
   0x4   :  { %13 = vsyncpa [#allocation4], 0 }
   0x5   :  { %15 = vsyncpa [#allocation4 + $0x1], 0  ;;  %s549_s9 = smov 0   ;;  %s551_s10 = smov 0  }
   0x6   :  { %s553_s11 = smov 0   ;;  %s555_s12 = smov 0  }
   0x7 LB: > { %s570_s13 = sadd.s32 4294967295, %s529_s12   ;;  %s331_s14 = sadd.s32 4294967294, %s529_s12   ;;  %s529_s12 = sphi %s555_s12, %s784_s12   ;;  %s525_s11 = sphi %s553_s11, %s783_s11   ;;  %s521_s10 = sphi %s551_s10, %s782_s10   ;;  %s517_s9 = sphi %s549_s9, %s781_s9  }
   0x8   : > { %s574_s15 = sadd.s32 1, %s529_s12   ;;  %s28_s16 = sadd.s32 1, %s525_s11 }
   0x9   : > { %s25_s17 = ssub.s32 %s529_s12, %s574_s15  ;;  %p35_p0 = scmp.ne.s32.totalorder %s525_s11, %s521_s10 }
   0xa   : > { %p26_p1 = scmp.eq.s32.totalorder %s25_s17, 0  ;;  %p36_p2 = scmp.eq.s32.totalorder %s529_s12, 0 }
   0xb   : > { %p41_p3 = scmp.ne.s32.totalorder %s521_s10, %s517_s9  ;;  %p42_p4 = scmp.eq.s32.totalorder %s570_s13, 0 }
   0xc   : > { %s586_s18 = scalar_select %p26_p1, %s525_s11, %s28_s16  }
   0xd   : > { %p588_p5 = por %p36_p2, %p35_p0  ;;  %p592_p6 = por %p42_p4, %p41_p3 }
   0xe   : > { %p91_p7 = scmp.eq.s32.totalorder %s570_s13, 1  ;;  %p97_p8 = scmp.eq.s32.totalorder %s331_s14, 1 }
   0xf   : > { %s769_s20 = scalar_select %p592_p6, 1, 0 }
  0x10   : > { %p363_p10 = scmp.lt.s32.totalorder %s529_s12, 2  ;;  %p599_p11 = por %p91_p7, %p35_p0 }
  0x11   : > { %p603_p12 = por %p97_p8, %p41_p3  ;;  %s608_s23 = sand.u32 1, %s525_s11  }
  0x12   : > { %s770_s21 = scalar_select %p599_p11, 1, 0 }
  0x13   : > { %s771_s22 = scalar_select %p603_p12, 1, 0 }
  0x14   : > { %s335_s24 = sshll.u32 %s529_s12, 7  ;;  %s334_s25 = sshll.u32 %s608_s23, 3 }
  0x15   : > { %s617_s28 = scalar_lea.hbm %s763_s0, %s335_s24  ;;  %s121_s29 = scalar_lea.vmem [#allocation2], %s334_s25 }
  0x16   : > { %s128_s30 = sshll.u32 %s121_s29, 4  ;;  %p623_p13 = pnand %p363_p10, %p588_p5  ;;  %s627_s30 = int_to_ptr.vmem [resolvable:$true] %s128_s30 }
  0x17   : > { %s118_s4 = scalar_lea.sflag [#allocation3], %s608_s23  ;;  %s399_s5 = scalar_lea.hbm %s617_s28, 128 }
  0x18   : > { %p400_p2 = scmp.ne.s32.totalorder %s617_s28, %s399_s5  ;;  %p401_p3 = pneg %p623_p13 }
  0x19   : > { %s404_s8 = scalar_lea.hbm %s763_s0, 256  ;;  %p405_p5 = scmp.lt.u32.totalorder %s617_s28, %s763_s0 }
  0x1a   : > { %p402_p4 = pnand %p401_p3, %p400_p2  ;;  %p406_p8 = scmp.lt.u32.totalorder %s404_s8, %s399_s5 }
  0x1b   : > { %p408_p9 = scmp.lt.u32.totalorder %s399_s5, %s617_s28 }
  0x1c   : > { %p403_p7 = pneg %p402_p4  ;;  %p407_p10 = por %p406_p8, %p405_p5 }
  0x1e   : > { %p409_p0 = por %p408_p9, %p407_p10 }
  0x20   : > { %p410_p1 = pnand %p409_p0, %p403_p7 }
  0x22   : > { %413 = shalt.err (!%p410_p1)
}
  0x23   : > { %s414_s17 = scalar_lea.vmem %s627_s30, 128  ;;  %s531_s19 = smov [#allocation2]  }
  0x24   : > { %p415_p2 = scmp.ne.s32.totalorder %s627_s30, %s414_s17  ;;  %s419_s26 = sshll.u32 %s531_s19, 4  ;;  %s420_s26 = int_to_ptr.vmem [resolvable:$false] %s419_s26 }
  0x25   : > { %s421_s27 = scalar_lea.vmem %s420_s26, 256  ;;  %p422_p11 = scmp.lt.s32.totalorder %s627_s30, %s420_s26 }
  0x26   : > { %p417_p4 = pnand %p415_p2, %p401_p3  ;;  %p423_p5 = scmp.lt.s32.totalorder %s421_s27, %s414_s17 }
  0x28   : > { %p418_p12 = pneg %p417_p4  ;;  %p424_p8 = por %p423_p5, %p422_p11 }
  0x2a   : > { %p425_p9 = pnand %p424_p8, %p418_p12 }
  0x2c   : > { %428 = shalt.err (!%p425_p9)
}
  0x2d   : > { %355 = dma.hbm_to_vmem [thread:$0]  (!%p623_p13), %s617_s28, 128, %s627_s30, %s118_s4  }
  0x2e   : > { %p773_p0 = scmp.lt.s32.totalorder %s529_s12, 3  ;;  %p774_p1 = scmp.ge.s32.totalorder %s529_s12, 1 }
  0x2f   : > { %s670_s7 = scalar_lea.hbm %s764_s1, %s335_s24  ;;  %s139_s8 = scalar_lea.vmem [#allocation5], %s334_s25 }
  0x30   : > { %p661_p7 = pnand %p774_p1, %p773_p0  ;;  %s146_s14 = sshll.u32 %s139_s8, 4  ;;  %s147_s14 = int_to_ptr.vmem [resolvable:$true] %s146_s14 }
  0x31   : > { %s136_s28 = scalar_lea.sflag [#allocation6], %s608_s23  ;;  %s429_s30 = scalar_lea.hbm %s670_s7, 128 }
  0x32   : > { %s775_s29 = scalar_select %p661_p7, 1, 0 }
  0x33   : > { %p430_p11 = scmp.ne.s32.totalorder %s670_s7, %s429_s30  ;;  %s434_s24 = scalar_lea.hbm %s764_s1, 256 }
  0x34   : > { %p435_p2 = scmp.lt.u32.totalorder %s670_s7, %s764_s1  ;;  %p436_p4 = scmp.lt.u32.totalorder %s434_s24, %s429_s30 }
  0x35   : > { %p432_p12 = pnand %p430_p11, %p401_p3  ;;  %p438_p8 = scmp.lt.u32.totalorder %s429_s30, %s670_s7 }
  0x36   : > { %p437_p5 = por %p436_p4, %p435_p2 }
  0x37   : > { %p433_p10 = pneg %p432_p12 }
  0x38   : > { %p439_p9 = por %p438_p8, %p437_p5 }
  0x3a   : > { %p440_p0 = pnand %p439_p9, %p433_p10 }
  0x3c   : > { %443 = shalt.err (!%p440_p0)
}
  0x3d   : > { %s444_s23 = scalar_lea.vmem %s147_s14, 128  ;;  %s532_s25 = smov [#allocation5]  }
  0x3e   : > { %p445_p1 = scmp.ne.s32.totalorder %s147_s14, %s444_s23  ;;  %s449_s26 = sshll.u32 %s532_s25, 4  ;;  %s450_s26 = int_to_ptr.vmem [resolvable:$false] %s449_s26 }
  0x3f   : > { %s451_s27 = scalar_lea.vmem %s450_s26, 256  ;;  %p452_p6 = scmp.lt.s32.totalorder %s147_s14, %s450_s26 }
  0x40   : > { %p447_p11 = pnand %p445_p1, %p401_p3  ;;  %p453_p7 = scmp.lt.s32.totalorder %s451_s27, %s444_s23 }
  0x42   : > { %p448_p12 = pneg %p447_p11  ;;  %p454_p2 = por %p453_p7, %p452_p6 }
  0x44   : > { %p455_p4 = pnand %p454_p2, %p448_p12 }
  0x46   : > { %458 = shalt.err (!%p455_p4)
}
  0x47   : > { %358 = dma.hbm_to_vmem [thread:$0]  (!%p623_p13), %s670_s7, 128, %s147_s14, %s136_s28  }
  0x48   : > { %p776_p10 = scmp.ne.s32.totalorder %s775_s29, 0 }
  0x49   : > { %s697_s5 = sand.u32 (!%p776_p10), 1, %s521_s10   ;;  %p777_p6 = scmp.ne.s32.totalorder (!%p776_p10), %s769_s20, 0 }
  0x4a   : > { %155 = sbr.rel (%p776_p10) target bundleno = 432 (0x1b0), region = 28  ;;  %s700_s6 = sshll.u32 (!%p776_p10), %s697_s5, 3 }
  0x4b   : > { %s158_s8 = scalar_lea.sflag (!%p776_p10), [#allocation3], %s697_s5  ;;  %s161_s30 = scalar_lea.vmem (!%p776_p10), [#allocation2], %s700_s6 }
  0x51   : > { %504 = dma.done.wait (%p777_p6), %s158_s8, 128  }
  0x52   : > { %506 = vsyncadd (%p777_p6), %s158_s8, 4294967168  ;;  %s167_s3 = scalar_lea.sflag [#allocation6], %s697_s5  ;;  %s170_s29 = scalar_lea.vmem [#allocation5], %s700_s6 }
  0x53   : > { %508 = dma.done.wait (%p777_p6), %s167_s3, 128  }
  0x54   : > { %510 = vsyncadd (%p777_p6), %s167_s3, 4294967168  ;;  %v196_v0 = vld [vmem:[%s161_s30] sm:$0xff]  ;;  %v197_v1 = vld [vmem:[%s170_s29] sm:$0xff]  ;;  %s343_s20 = sshll.u32 %s570_s13, 7  ;;  %s195_s7 = scalar_lea.vmem [#allocation7], %s700_s6 }
  0x55   : > { %v198_v2 = vadd.f32 %v197_v1, %v196_v0  ;;  %s238_s14 = sshll.u32 %s195_s7, 4  ;;  %s719_s16 = scalar_lea.hbm %s765_s2, %s343_s20  ;;  %s721_s14 = int_to_ptr.vmem [resolvable:$true] %s238_s14 }
  0x56   : > { %s225_s24 = scalar_lea.sflag [#allocation4], %s697_s5  ;;  %s459_s17 = scalar_lea.vmem %s721_s14, 128 }
  0x57   : > { %199 = vadd.xlane.f32.xlu0 %v198_v2  ;;  %p460_p13 = scmp.ne.s32.totalorder %s721_s14, %s459_s17  ;;  %p778_p3 = scmp.ne.s32.totalorder %s770_s21, 0 }
  0x58   : > { %s533_s13 = smov [#allocation7]  }
  0x59   : > { %p461_p7 = pnand %p460_p13, %p778_p3  ;;  %s463_s19 = sshll.u32 %s533_s13, 4  ;;  %s464_s19 = int_to_ptr.vmem [resolvable:$false] %s463_s19 }
  0x5a   : > { %s465_s23 = scalar_lea.vmem %s464_s19, 256  ;;  %p466_p8 = scmp.lt.s32.totalorder %s721_s14, %s464_s19 }
  0x5b   : > { %p462_p5 = pneg %p461_p7  ;;  %p467_p9 = scmp.lt.s32.totalorder %s465_s23, %s459_s17 }
  0x5d   : > { %p468_p0 = por %p467_p9, %p466_p8 }
  0x5f   : > { %p469_p1 = pnand %p468_p0, %p462_p5 }
  0xe4   : > { %v200_v3 = vpop.xlane.xlu0 %199 }
  0xe5   : > { %v201_v4 = vrot.slane %v200_v3, 4 }
  0xe7   : > { %v202_v5 = vadd.f32 %v201_v4, %v200_v3 }
  0xe9   : > { %v203_v6 = vrot.slane %v202_v5, 2 }
  0xeb   : > { %v204_v7 = vadd.f32 %v203_v6, %v202_v5 }
  0xed   : > { %v205_v8 = vrot.slane %v204_v7, 1 }
  0xef   : > { %v206_v9 = vadd.f32 %v205_v8, %v204_v7 }
  0xf1   : > { %v208_v10 = vmul.f32 0.0009765625, %v206_v9 }
  0xf3   : > { %v209_v11 = vsub.f32 %v198_v2, %v208_v10 }
  0xf5   : > { %v210_v12 = vmul.f32 %v209_v11, %v209_v11 }
  0xf7   : > { %211 = vadd.xlane.f32.xlu0 %v210_v12 }
 0x184   : > { %v212_v13 = vpop.xlane.xlu0 %211 }
 0x185   : > { %v213_v14 = vrot.slane %v212_v13, 4 }
 0x187   : > { %v214_v15 = vadd.f32 %v213_v14, %v212_v13 }
 0x189   : > { %v215_v16 = vrot.slane %v214_v15, 2 }
 0x18b   : > { %v216_v17 = vadd.f32 %v215_v16, %v214_v15 }
 0x18d   : > { %v217_v18 = vrot.slane %v216_v17, 1 }
 0x18f   : > { %v218_v19 = vadd.f32 %v217_v18, %v216_v17 }
 0x191   : > { %v219_v20 = vmul.f32 0.0009765625, %v218_v19 }
 0x193   : > { %v220_v21 = vadd.f32 1e-05, %v219_v20 }
 0x195   : > { %397 = vrsqrt.f32 %v220_v21 }
 0x19f   : > { %v398_v22 = vpop.eup %397 }
 0x1a0   : > { %v222_v23 = vmul.f32 %v398_v22, %v209_v11 }
 0x1a2   : > { %223 = vst [vmem:[%s195_s7] sm:$0xff] %v222_v23 }
 0x1a3   : > { %472 = shalt.err (!%p469_p1)
}
 0x1a4   : > { %s473_s25 = scalar_lea.hbm %s719_s16, 128  ;;  %s477_s5 = scalar_lea.hbm %s765_s2, 256 }
 0x1a5   : > { %p474_p11 = scmp.ne.s32.totalorder %s719_s16, %s473_s25  ;;  %p478_p4 = scmp.lt.u32.totalorder %s719_s16, %s765_s2 }
 0x1a6   : > { %p479_p10 = scmp.lt.u32.totalorder %s477_s5, %s473_s25  ;;  %p481_p13 = scmp.lt.u32.totalorder %s473_s25, %s719_s16 }
 0x1a7   : > { %p475_p12 = pnand %p474_p11, %p778_p3 }
 0x1a8   : > { %p480_p6 = por %p479_p10, %p478_p4 }
 0x1a9   : > { %p476_p2 = pneg %p475_p12 }
 0x1aa   : > { %p482_p7 = por %p481_p13, %p480_p6 }
 0x1ac   : > { %p483_p5 = pnand %p482_p7, %p476_p2 }
 0x1ae   : > { %486 = shalt.err (!%p483_p5)
}
 0x1af   : > { %350 = dma.vmem_to_hbm [thread:$0]  (%p778_p3), %s721_s14, 128, %s719_s16, %s225_s24  }
 0x1b0 PF: > { %s250_s30 = sand.u32 1, %s517_s9   ;;  %p779_p8 = scmp.ne.s32.totalorder %s771_s22, 0 }
 0x1b1   : > { %p780_p9 = scmp.ge.s32.totalorder %s529_s12, 2  ;;  %s251_s3 = scalar_lea.sflag [#allocation4], %s250_s30 }
 0x1b3   : > { %p360_p0 = pnand %p780_p9, %p779_p8 }
 0x1b5   : > { %512 = dma.done.wait (!%p360_p0), %s251_s3, 128  }
 0x1b6   : > { %514 = vsyncadd (!%p360_p0), %s251_s3, 4294967168  ;;  %p18_p1 = scmp.ge.s32.totalorder %s574_s15, 4   ;;  %s781_s9 = smov %s521_s10 }
 0x1b7   : > { %s782_s10 = smov %s525_s11  ;;  %s783_s11 = smov %s586_s18 }
 0x1b8   : > { %s784_s12 = smov %s574_s15  ;;  %20 = sbr.rel (!%p18_p1) target bundleno = 7 (0x7), region = 86 }
 0x1bf   :  { %256 = vsyncpa [#allocation3], 1 }
 0x1c0   :  { %258 = vsyncpa [#allocation3 + $0x1], 1 }
 0x1c1   :  { %259 = vsyncpa [#allocation6], 1 }
 0x1c2   :  { %261 = vsyncpa [#allocation6 + $0x1], 1 }
 0x1c3   :  { %262 = vsyncpa [#allocation4], 1 }
 0x1c4   :  { %264 = vsyncpa [#allocation4 + $0x1], 1 }

</bundles_post_ra>
